<compile_context>
chip_gen: v5e
topology: v5e:2x2
jax: 0.10.0
libtpu: 0.0.40
codegen_flags: <defaults>
</compile_context>

<pallas_src>
import functools

import jax
import jax.numpy as jnp
from jax.experimental import pallas as pl
from jax.experimental.pallas import tpu as pltpu


def _round_up(n, m):
    return ((n + m - 1) // m) * m


# ---------------------------------------------------------------------------
# Kernel: grid = (batch_tiles, T).  Weights resident; hidden carried in VMEM.
# ---------------------------------------------------------------------------
def _indrnn_seq_kernel(x_ref, wih_ref, bias_ref, whh_ref, h0_ref,
                       out_ref, h_scr, *, nonlinearity):
    t = pl.program_id(1)

    # New batch tile starts its time loop: load the initial hidden state.
    @pl.when(t == 0)
    def _():
        h_scr[...] = h0_ref[...].astype(jnp.float32)

    # MXU matmul (tB, I_pad) @ (I_pad, H_pad) -> (tB, H_pad), f32 accumulate.
    pre = jnp.dot(x_ref[...], wih_ref[...], preferred_element_type=jnp.float32)
    # f32 elementwise epilogue: + bias (broadcast over batch) + w_hh * h_prev.
    pre = pre + bias_ref[...].astype(jnp.float32) \
              + whh_ref[...].astype(jnp.float32) * h_scr[...]
    if nonlinearity == "relu":
        h_new = jnp.maximum(pre, 0.0)
    else:  # 'tanh'
        h_new = jnp.tanh(pre)

    h_scr[...] = h_new
    out_ref[...] = h_new.astype(out_ref.dtype)


# ---------------------------------------------------------------------------
# One-time parameter layout prep (done at init time, NOT per call):
#   pre-transpose weight_ih to (I, H) and zero-pad I/H up to multiples of 128.
# ---------------------------------------------------------------------------
def prepare_indrnn_params(weight_ih, weight_hh, bias_ih):
    H, I = weight_ih.shape
    I_pad = _round_up(I, 128)
    H_pad = _round_up(H, 128)
    wih_t = jnp.zeros((I_pad, H_pad), jnp.float32).at[:I, :H].set(
        weight_ih.astype(jnp.float32).T)
    whh_row = jnp.zeros((1, H_pad), jnp.float32).at[0, :H].set(
        weight_hh.astype(jnp.float32))
    bias_row = jnp.zeros((1, H_pad), jnp.float32).at[0, :H].set(
        bias_ih.astype(jnp.float32))
    return wih_t, whh_row, bias_row


# ---------------------------------------------------------------------------
# Full-sequence forward: x_seq (T, B, I), h0 (B, H) -> (T, B, H)
# ---------------------------------------------------------------------------
def indrnn_sequence_forward(x_seq, h0, wih_t, whh_row, bias_row, hidden_size,
                            *, nonlinearity="relu"):
    T, B, I = x_seq.shape
    I_pad, H_pad = wih_t.shape
    H = hidden_size
    assert h0.shape == (B, H)

    # Batch tiling: sublane-aligned; tile at 256 rows when B is large so the
    # pipeline has multiple parallel steps without blowing VMEM (v7x: 64 MiB).
    tB = 256 if B >= 256 else _round_up(B, 8)
    B_pad = _round_up(B, tB)

    x_p = x_seq
    if (B_pad, I_pad) != (B, I):
        x_p = jnp.zeros((T, B_pad, I_pad), x_seq.dtype).at[:, :B, :I].set(x_seq)
    h0_p = h0
    if (B_pad, H_pad) != (B, H):
        h0_p = jnp.zeros((B_pad, H_pad), h0.dtype).at[:B, :H].set(h0)

    grid = (B_pad // tB, T)
    kernel = functools.partial(_indrnn_seq_kernel, nonlinearity=nonlinearity)

    elem = jnp.dtype(x_seq.dtype).itemsize
    cost = pl.CostEstimate(
        flops=2 * T * B_pad * I_pad * H_pad,
        transcendentals=(T * B_pad * H_pad) if nonlinearity == "tanh" else 0,
        bytes_accessed=(x_p.size + wih_t.size + bias_row.size + whh_row.size
                        + h0_p.size + T * B_pad * H_pad) * elem,
    )

    out = pl.pallas_call(
        kernel,
        out_shape=jax.ShapeDtypeStruct((T, B_pad, H_pad), x_seq.dtype),
        grid_spec=pltpu.PrefetchScalarGridSpec(
            num_scalar_prefetch=0,
            grid=grid,
            in_specs=[
                # x: one (tB, I_pad) slab per (batch tile, timestep)
                pl.BlockSpec((None, tB, I_pad), lambda b, t: (t, b, 0)),
                # weight_ih^T: resident in VMEM across the whole grid
                pl.BlockSpec((I_pad, H_pad), lambda b, t: (0, 0)),
                # bias / weight_hh rows: resident
                pl.BlockSpec((1, H_pad), lambda b, t: (0, 0)),
                pl.BlockSpec((1, H_pad), lambda b, t: (0, 0)),
                # initial hidden: resident per batch tile (only read at t==0)
                pl.BlockSpec((tB, H_pad), lambda b, t: (b, 0)),
            ],
            out_specs=pl.BlockSpec((None, tB, H_pad), lambda b, t: (t, b, 0)),
            scratch_shapes=[pltpu.VMEM((tB, H_pad), jnp.float32)],
        ),
        compiler_params=pltpu.CompilerParams(
            dimension_semantics=("parallel", "arbitrary")),
        cost_estimate=cost,
    )(x_p, wih_t, bias_row, whh_row, h0_p)

    return out[:, :B, :H]


# ---------------------------------------------------------------------------
# Single-cell forward (exactly IndRNNCell.forward): x (B, I), hx (B, H)
# ---------------------------------------------------------------------------
def indrnn_cell_forward(x, hx, wih_t, whh_row, bias_row, hidden_size,
                        *, nonlinearity="relu"):
    out = indrnn_sequence_forward(x[None], hx, wih_t, whh_row, bias_row,
                                  hidden_size, nonlinearity=nonlinearity)
    return out[0]


# ---------------------------------------------------------------------------
# Init-time helpers mirroring the PyTorch module
# ---------------------------------------------------------------------------
def check_bounds(weight, min_abs, max_abs):
    """JAX mirror of the PyTorch check_bounds used at init time."""
    if min_abs:
        abs_kernel = jnp.maximum(jnp.abs(weight), min_abs)
        weight = jnp.sign(weight) * abs_kernel
    if max_abs:
        weight = jnp.clip(weight, -max_abs, max_abs)
    return weight


def init_indrnn_params(key, input_size, hidden_size,
                       hidden_min_abs=0, hidden_max_abs=None):
    """Matches IndRNNCell.reset_parameters(): W_ih~N(0,0.01), w_hh=1, b_ih=0."""
    weight_ih = 0.01 * jax.random.normal(key, (hidden_size, input_size),
                                         dtype=jnp.float32)
    weight_hh = jnp.ones((hidden_size,), dtype=jnp.float32)
    weight_hh = check_bounds(weight_hh, hidden_min_abs, hidden_max_abs)
    bias_ih = jnp.zeros((hidden_size,), dtype=jnp.float32)
    return weight_ih, weight_hh, bias_ih


if __name__ == "__main__":
    batch, input_size, hidden_size, seq_len = 8, 16, 32, 6

    key = jax.random.PRNGKey(0)
    k_w, k_x, k_h = jax.random.split(key, 3)

    weight_ih, weight_hh, bias_ih = init_indrnn_params(
        k_w, input_size, hidden_size)
    # one-time layout prep (transpose + lane padding) -- not on the hot path
    wih_t, whh_row, bias_row = prepare_indrnn_params(
        weight_ih, weight_hh, bias_ih)

    x_seq = jax.random.normal(k_x, (seq_len, batch, input_size),
                              dtype=jnp.float32)
    h0 = jax.random.normal(k_h, (batch, hidden_size), dtype=jnp.float32)

    # 1) full-sequence kernel (weights stay resident across timesteps)
    h_seq = indrnn_sequence_forward(x_seq, h0, wih_t, whh_row, bias_row,
                                    hidden_size)
    h_seq = jax.block_until_ready(h_seq)

    # pure-JAX reference (per-timestep cell loop, like the docstring example)
    def ref_cell(x, hx):
        return jnp.maximum(x @ weight_ih.T + bias_ih + weight_hh * hx, 0.0)

    hx_ref = h0
    refs = []
    for t in range(seq_len):
        hx_ref = ref_cell(x_seq[t], hx_ref)
        refs.append(hx_ref)
    ref_seq = jnp.stack(refs)

    assert h_seq.shape == (seq_len, batch, hidden_size)
    assert jnp.allclose(h_seq, ref_seq, atol=1e-5, rtol=1e-4)

    # 2) single-cell forward (exact IndRNNCell.forward semantics)
    h1 = indrnn_cell_forward(x_seq[0], h0, wih_t, whh_row, bias_row,
                             hidden_size)
    h1 = jax.block_until_ready(h1)
    assert jnp.allclose(h1, ref_cell(x_seq[0], h0), atol=1e-5, rtol=1e-4)

    print("KERNEL_OK")
</pallas_src>

<mosaic_0001>
module attributes {stable_mosaic.version = 11 : i64} {
  func.func @_indrnn_seq_kernel(%arg0: i32, %arg1: i32, %arg2: memref<1x8x128xf32, #tpu.memory_space<vmem>>, %arg3: memref<128x128xf32, #tpu.memory_space<vmem>>, %arg4: memref<1x128xf32, #tpu.memory_space<vmem>>, %arg5: memref<1x128xf32, #tpu.memory_space<vmem>>, %arg6: memref<8x128xf32, #tpu.memory_space<vmem>>, %arg7: memref<1x8x128xf32, #tpu.memory_space<vmem>>, %arg8: memref<8x128xf32, #tpu.memory_space<vmem>>) attributes {dimension_semantics = [#tpu.dimension_semantics<parallel>, #tpu.dimension_semantics<arbitrary>], iteration_bounds = array<i64: 1, 6>, scalar_prefetch = 0 : i64, scratch_operands = 1 : i64, tpu.core_type = #tpu.core_type<tc>, window_params = [{transform_indices = @transform_0, window_bounds = array<i64: 1, 8, 128>}, {pipeline_mode = #tpu.pipeline_mode<synchronous>, transform_indices = @transform_1, window_bounds = array<i64: 128, 128>}, {pipeline_mode = #tpu.pipeline_mode<synchronous>, transform_indices = @transform_2, window_bounds = array<i64: 1, 128>}, {pipeline_mode = #tpu.pipeline_mode<synchronous>, transform_indices = @transform_3, window_bounds = array<i64: 1, 128>}, {transform_indices = @transform_4, window_bounds = array<i64: 8, 128>}, {transform_indices = @transform_5, window_bounds = array<i64: 1, 8, 128>}]} {
    %c0_i32 = arith.constant 0 : i32
    %0 = arith.cmpi eq, %arg1, %c0_i32 : i32
    %1 = arith.extui %0 : i1 to i32
    %c0_i32_0 = arith.constant 0 : i32
    %2 = arith.cmpi ne, %1, %c0_i32_0 : i32
    scf.if %2 {
      %c0_17 = arith.constant 0 : index
      %c0_18 = arith.constant 0 : index
      %21 = vector.load %arg6[%c0_17, %c0_18] : memref<8x128xf32, #tpu.memory_space<vmem>>, vector<8x128xf32>
      %c0_19 = arith.constant 0 : index
      %c0_20 = arith.constant 0 : index
      %22 = vector.load %arg8[%c0_19, %c0_20] : memref<8x128xf32, #tpu.memory_space<vmem>>, vector<8x128xf32>
      tpu.vector_store %arg8[%c0_19, %c0_20], %21 {strides = array<i32>} : memref<8x128xf32, #tpu.memory_space<vmem>>, vector<8x128xf32>,
    } else {
    }
    %c0 = arith.constant 0 : index
    %c0_1 = arith.constant 0 : index
    %c0_2 = arith.constant 0 : index
    %3 = vector.load %arg2[%c0, %c0_1, %c0_2] : memref<1x8x128xf32, #tpu.memory_space<vmem>>, vector<1x8x128xf32>
    %4 = vector.shape_cast %3 : vector<1x8x128xf32> to vector<8x128xf32>
    %c0_3 = arith.constant 0 : index
    %c0_4 = arith.constant 0 : index
    %5 = vector.load %arg3[%c0_3, %c0_4] : memref<128x128xf32, #tpu.memory_space<vmem>>, vector<128x128xf32>
    %cst = arith.constant dense<0.000000e+00> : vector<8x128xf32>
    %6 = tpu.matmul %4, %5, %cst {dimension_numbers = #tpu.dot_dimension_numbers<[1], [0], [0], [1], [0, 0, 1, 1], [], []>} : vector<8x128xf32>, vector<128x128xf32>, vector<8x128xf32> -> vector<8x128xf32>
    %c0_5 = arith.constant 0 : index
    %c0_6 = arith.constant 0 : index
    %7 = vector.load %arg4[%c0_5, %c0_6] : memref<1x128xf32, #tpu.memory_space<vmem>>, vector<1x128xf32>
    %8 = vector.broadcast %7 : vector<1x128xf32> to vector<8x128xf32>
    %9 = arith.addf %6, %8 : vector<8x128xf32>
    %c0_7 = arith.constant 0 : index
    %c0_8 = arith.constant 0 : index
    %10 = vector.load %arg5[%c0_7, %c0_8] : memref<1x128xf32, #tpu.memory_space<vmem>>, vector<1x128xf32>
    %c0_9 = arith.constant 0 : index
    %c0_10 = arith.constant 0 : index
    %11 = vector.load %arg8[%c0_9, %c0_10] : memref<8x128xf32, #tpu.memory_space<vmem>>, vector<8x128xf32>
    %12 = vector.broadcast %10 : vector<1x128xf32> to vector<8x128xf32>
    %13 = arith.mulf %12, %11 : vector<8x128xf32>
    %14 = arith.addf %9, %13 : vector<8x128xf32>
    %cst_11 = arith.constant 0.000000e+00 : f32
    %15 = vector.broadcast %cst_11 : f32 to vector<8x128xf32>
    %16 = arith.maximumf %14, %15 : vector<8x128xf32>
    %c0_12 = arith.constant 0 : index
    %c0_13 = arith.constant 0 : index
    %17 = vector.load %arg8[%c0_12, %c0_13] : memref<8x128xf32, #tpu.memory_space<vmem>>, vector<8x128xf32>
    tpu.vector_store %arg8[%c0_12, %c0_13], %16 {strides = array<i32>} : memref<8x128xf32, #tpu.memory_space<vmem>>, vector<8x128xf32>,
    %c0_14 = arith.constant 0 : index
    %c0_15 = arith.constant 0 : index
    %c0_16 = arith.constant 0 : index
    %18 = vector.load %arg7[%c0_14, %c0_15, %c0_16] : memref<1x8x128xf32, #tpu.memory_space<vmem>>, vector<1x8x128xf32>
    %19 = vector.shape_cast %18 : vector<1x8x128xf32> to vector<8x128xf32>
    %20 = vector.shape_cast %16 : vector<8x128xf32> to vector<1x8x128xf32>
    tpu.vector_store %arg7[%c0_14, %c0_15, %c0_16], %20 {strides = array<i32>} : memref<1x8x128xf32, #tpu.memory_space<vmem>>, vector<1x8x128xf32>,
    return
  }
  func.func @transform_0(%arg0: i32, %arg1: i32) -> (i32, i32, i32) {
    %c0_i32 = arith.constant 0 : i32
    %c0_i32_0 = arith.constant 0 : i32
    return %arg1, %arg0, %c0_i32 : i32, i32, i32
  }
  func.func @transform_1(%arg0: i32, %arg1: i32) -> (i32, i32) {
    %c0_i32 = arith.constant 0 : i32
    %c0_i32_0 = arith.constant 0 : i32
    %c0_i32_1 = arith.constant 0 : i32
    return %c0_i32, %c0_i32_0 : i32, i32
  }
  func.func @transform_2(%arg0: i32, %arg1: i32) -> (i32, i32) {
    %c0_i32 = arith.constant 0 : i32
    %c0_i32_0 = arith.constant 0 : i32
    %c0_i32_1 = arith.constant 0 : i32
    return %c0_i32, %c0_i32_0 : i32, i32
  }
  func.func @transform_3(%arg0: i32, %arg1: i32) -> (i32, i32) {
    %c0_i32 = arith.constant 0 : i32
    %c0_i32_0 = arith.constant 0 : i32
    %c0_i32_1 = arith.constant 0 : i32
    return %c0_i32, %c0_i32_0 : i32, i32
  }
  func.func @transform_4(%arg0: i32, %arg1: i32) -> (i32, i32) {
    %c0_i32 = arith.constant 0 : i32
    %c0_i32_0 = arith.constant 0 : i32
    return %arg0, %c0_i32 : i32, i32
  }
  func.func @transform_5(%arg0: i32, %arg1: i32) -> (i32, i32, i32) {
    %c0_i32 = arith.constant 0 : i32
    %c0_i32_0 = arith.constant 0 : i32
    return %arg1, %arg0, %c0_i32 : i32, i32, i32
  }
}

</mosaic_0001>

<bundles_post_ra>
// kernel: tpu_custom_call.1
= control target key start
LH: loop header
LB: loop body
LE: loop exit
PB: predicated region body
PF: predicated region fallthrough
CT: control target
= control target key end

     0   :  { %10 = vsyncpa [#allocation4], 0  ;;  %s945_s0 = inlined_call_operand.hbm [shape: f32[6,8,128], index: 0, kind: input, shape index: {}]   ;;  %s946_s1 = inlined_call_operand.hbm [shape: f32[128,128], index: 1, kind: input, shape index: {}]   ;;  %s947_s2 = inlined_call_operand.vmem [shape: f32[1,128], index: 2, kind: input, shape index: {}]   ;;  %s948_s3 = inlined_call_operand.vmem [shape: f32[1,128], index: 3, kind: input, shape index: {}]   ;;  %s949_s4 = inlined_call_operand.hbm [shape: f32[8,128], index: 4, kind: input, shape index: {}]   ;;  %s950_s5 = inlined_call_operand.hbm [shape: f32[6,8,128], index: 5, kind: output, shape index: {}]  }
   0x1   :  { %12 = vsyncpa [#allocation4 + $0x1], 0 }
   0x2   :  { %13 = vsyncpa [#allocation7], 0 }
   0x3   :  { %14 = vsyncpa [#allocation5], 0 }
   0x4   :  { %16 = vsyncpa [#allocation5 + $0x1], 0  ;;  %s789_s18 = smov 0   ;;  %s791_s19 = smov 0  }
   0x5   :  { %s793_s20 = smov 0   ;;  %s795_s21 = smov 0  }
   0x6   :  { %s797_s22 = smov 0   ;;  %s799_s23 = smov 0  }
   0x7 LB: > { %s472_s24 = sadd.s32 4294967295, %s753_s23   ;;  %p474_p0 = scmp.ge.s32.totalorder %s753_s23, 1  ;;  %s753_s23 = sphi %s799_s23, %s22_s23   ;;  %s749_s22 = sphi %s797_s22, %s960_s22   ;;  %s745_s21 = sphi %s795_s21, %s959_s21   ;;  %s741_s20 = sphi %s793_s20, %s958_s20   ;;  %s737_s19 = sphi %s791_s19, %s957_s19   ;;  %s733_s18 = sphi %s789_s18, %s956_s18  }
   0x8   : > { %p823_p1 = scmp.eq.s32.totalorder %s472_s24, 0  ;;  %p184_p2 = scmp.lt.s32.totalorder %s753_s23, 7 }
   0x9   : > { %s195_s28 = sshll.u32 %s946_s1, 4  ;;  %s755_s30 = smov [#allocation6]   ;;  %s196_s28 = int_to_ptr.hbm [resolvable:$true] %s195_s28 }
   0xa   : > { %p831_p3 = pnand %p474_p0, %p184_p2  ;;  %s197_s6 = sshll.u32 %s755_s30, 4  ;;  %s198_s6 = int_to_ptr.vmem [resolvable:$true] %s197_s6 }
   0xb   : > { %s218_s9 = sshll.u32 %s949_s4, 4  ;;  %s756_s10 = smov 128   ;;  %s219_s9 = int_to_ptr.hbm [resolvable:$true] %s218_s9 }
   0xc   : > { %p502_p4 = pneg %p831_p3  ;;  %s757_s11 = smov 8  }
   0xd   : > { %s758_s12 = smov [#allocation8]   ;;  %s31_s14 = sadd.s32 1, %s749_s22 }
   0xe   : > { %p503_p5 = pnand %p502_p4, %p823_p1  ;;  %s220_s13 = sshll.u32 %s758_s12, 4  ;;  %s221_s13 = int_to_ptr.vmem [resolvable:$true] %s220_s13 }
   0xf   : > { %s473_s15 = sadd.s32 4294967294, %s753_s23   ;;  %p32_p6 = scmp.ge.s32.totalorder %s31_s14, 6 }
  0x10   : > { %505 = dma.hbm_to_vmem [thread:$0]  (!%p503_p5), %s196_s28, 2048, %s198_s6, [#allocation7], %s756_s10, %s756_s10, %s757_s11  }
  0x11   : > { %508 = dma.hbm_to_vmem [thread:$0]  (!%p503_p5), %s219_s9, 128, %s221_s13, [#allocation7]  }
  0x12   : > { %s43_s16 = sadd.s32 1, %s741_s20  ;;  %p50_p7 = scmp.ne.s32.totalorder %s741_s20, %s737_s19 }
  0x13   : > { %s962_s14 = smov (%p32_p6, %s31_s14), 0  ;;  %p51_p8 = scmp.eq.s32.totalorder %s753_s23, 0 }
  0x14   : > { %p56_p9 = scmp.ne.s32.totalorder %s737_s19, %s733_s18  ;;  %s38_s17 = ssub.s32 %s749_s22, %s962_s14 }
  0x15   : > { %p171_p10 = scmp.eq.s32.totalorder %s472_s24, 5  ;;  %p41_p11 = scmp.eq.s32.totalorder %s38_s17, 0 }
  0x16   : > { %p858_p12 = por %p823_p1, %p56_p9  ;;  %p177_p0 = scmp.eq.s32.totalorder %s473_s15, 5 }
  0x17   : > { %p862_p13 = por %p171_p10, %p50_p7  ;;  %p52_p2 = por %p51_p8, %p50_p7 }
  0x18   : > { %s867_s28 = scalar_select %p41_p11, %s741_s20, %s43_s16  }
  0x19   : > { %p869_p4 = por %p177_p0, %p56_p9  ;;  %s231_s6 = sand.u32 1, %s741_s20  }
  0x1a   : > { %s479_s24 = sshll.u32 %s749_s22, 3  ;;  %p519_p5 = scmp.lt.s32.totalorder %s753_s23, 6 }
  0x1b   : > { %s478_s7 = sshll.u32 %s231_s6, 3  ;;  %s240_s10 = scalar_lea.hbm %s945_s0, %s479_s24 }
  0x1c   : > { %s242_s11 = sshll.u32 %s240_s10, 4  ;;  %s235_s12 = scalar_lea.vmem [#allocation3], %s478_s7  ;;  %s243_s11 = int_to_ptr.hbm [resolvable:$true] %s242_s11 }
  0x1d   : > { %s244_s13 = sshll.u32 %s235_s12, 4  ;;  %p510_p6 = pnand %p519_p5, %p52_p2  ;;  %s245_s13 = int_to_ptr.vmem [resolvable:$true] %s244_s13 }
  0x1e   : > { %s232_s15 = scalar_lea.sflag [#allocation4], %s231_s6  ;;  %253 = sbr.rel (%p831_p3) target bundleno = 215 (0xd7), region = 40 }
  0x1f   : > { %512 = dma.hbm_to_vmem [thread:$0]  (!%p510_p6), %s243_s11, 128, %s245_s13, %s232_s15  }
  0x20   : > { %s882_s16 = sand.u32 (!%p831_p3), 1, %s737_s19  }
  0x21   : > { %s481_s17 = sshll.u32 (!%p831_p3), %s882_s16, 3  ;;  %s256_s8 = scalar_lea.sflag (!%p831_p3), [#allocation4], %s882_s16 }
  0x22   : > { %s886_s24 = scalar_lea.vmem (!%p831_p3), [#allocation3], %s481_s17 }
  0x23   : > { %720 = dma.done.wait (%p858_p12), %s256_s8, 128  }
  0x24   : > { %722 = vsyncadd (%p858_p12), %s256_s8, 4294967168 }
  0x25   : > { %724 = dma.done.wait (%p823_p1), [#allocation7], 2176  }
  0x26   : > { %726 = vsyncadd (%p823_p1), [#allocation7], 4294965120  ;;  %s896_s29 = scalar_lea.vmem [#allocation9], %s481_s17  ;;  %p485_p3 = scmp.ne.s32.totalorder %s745_s21, 0 }
  0x28   : > { %300 = sbr.rel (%p485_p3) target bundleno = 47 (0x2f), region = 56 }
  0x2d   : > { %v301_v0 = vld [vmem:[#allocation8] sm:$0xff] }
  0x2e   : > { %302 = vst [vmem:[#allocation2] sm:$0xff] %v301_v0 }
  0x2f PF: > { %v319_v1 = vld [vmem:[#allocation6 + $0x78] sm:$0xff]  ;;  %v318_v2 = vld [vmem:[#allocation6 + $0x70] sm:$0xff]  ;;  %v317_v3 = vld [vmem:[#allocation6 + $0x68] sm:$0xff]  ;;  %s487_s9 = sshll.u32 %s745_s21, 3  ;;  %s368_s13 = sshll.u32 %s896_s29, 4  ;;  %s369_s13 = int_to_ptr.vmem [resolvable:$true] %s368_s13 }
  0x30   : > { %324 = vmatpush.msra.mxu0 %v319_v1  ;;  %v316_v4 = vld [vmem:[#allocation6 + $0x60] sm:$0xff]  ;;  %v315_v5 = vld [vmem:[#allocation6 + $0x58] sm:$0xff]  ;;  %v314_v6 = vld [vmem:[#allocation6 + $0x50] sm:$0xff]  ;;  %s366_s12 = scalar_lea.hbm %s950_s5, %s487_s9  ;;  %s355_s17 = scalar_lea.sflag [#allocation5], %s882_s16 }
  0x31   : > { %v313_v7 = vld [vmem:[#allocation6 + $0x48] sm:$0xff]  ;;  %v312_v8 = vld [vmem:[#allocation6 + $0x40] sm:$0xff]  ;;  %v311_v9 = vld [vmem:[#allocation6 + $0x38] sm:$0xff]  ;;  %s370_s15 = sshll.u32 %s366_s12, 4  ;;  %s687_s26 = scalar_lea.hbm %s950_s5, 48  ;;  %s371_s15 = int_to_ptr.hbm [resolvable:$true] %s370_s15 }
  0x32   : > { %325 = vmatpush.msra.mxu0 %v318_v2  ;;  %v310_v10 = vld [vmem:[#allocation6 + $0x30] sm:$0xff]  ;;  %v309_v11 = vld [vmem:[#allocation6 + $0x28] sm:$0xff]  ;;  %v308_v12 = vld [vmem:[#allocation6 + $0x20] sm:$0xff]  ;;  %s681_s8 = sshra.s32 %s371_s15, 4  ;;  %s682_s8 = int_to_ptr.hbm [resolvable:$true] %s681_s8 }
  0x33   : > { %v307_v13 = vld [vmem:[#allocation6 + $0x18] sm:$0xff]  ;;  %v306_v14 = vld [vmem:[#allocation6 + $0x10] sm:$0xff]  ;;  %v305_v15 = vld [vmem:[#allocation6 + $0x8] sm:$0xff]  ;;  %s683_s21 = scalar_lea.hbm %s682_s8, 8  ;;  %p688_p9 = scmp.lt.s32.totalorder %s682_s8, %s950_s5 }
  0x34   : > { %326 = vmatpush.msra.mxu0 %v317_v3  ;;  %v304_v16 = vld [vmem:[#allocation6] sm:$0xff]  ;;  %v303_v17 = vld [vmem:[%s886_s24] sm:$0xff]  ;;  %v576_v18 = vld [vmem:[%s948_s3] ss:$0 sm:$0xff]  ;;  %p684_p1 = scmp.ne.s32.totalorder %s682_s8, %s683_s21  ;;  %p689_p10 = scmp.lt.s32.totalorder %s687_s26, %s683_s21 }
  0x35   : > { %v345_v19 = vld [vmem:[#allocation2] sm:$0xff] }
  0x36   : > { %327 = vmatpush.msra.mxu0 %v316_v4  ;;  %v575_v20 = vld [vmem:[%s947_s2] ss:$0 sm:$0xff]  ;;  %v349_v21 = vmul.f32 %v576_v18, %v345_v19  ;;  %p685_p7 = pnand %p684_p1, %p862_p13  ;;  %p690_p11 = por %p689_p10, %p688_p9 }
  0x38   : > { %328 = vmatpush.msra.mxu0 %v315_v5  ;;  %p686_p8 = pneg %p685_p7 }
  0x3a   : > { %329 = vmatpush.msra.mxu0 %v314_v6  ;;  %p691_p12 = pnand %p690_p11, %p686_p8 }
  0x3c   : > { %330 = vmatpush.msra.mxu0 %v313_v7 }
  0x3e   : > { %331 = vmatpush.msra.mxu0 %v312_v8 }
  0x40   : > { %332 = vmatpush.msra.mxu0 %v311_v9 }
  0x42   : > { %333 = vmatpush.msra.mxu0 %v310_v10 }
  0x44   : > { %334 = vmatpush.msra.mxu0 %v309_v11 }
  0x46   : > { %335 = vmatpush.msra.mxu0 %v308_v12 }
  0x48   : > { %336 = vmatpush.msra.mxu0 %v307_v13 }
  0x4a   : > { %337 = vmatpush.msra.mxu0 %v306_v14 }
  0x4c   : > { %338 = vmatpush.msra.mxu0 %v305_v15 }
  0x4e   : > { %339 = vmatpush.msra.mxu0 %v304_v16 }
  0x4f   : > { %340 = vmatmul.f32.vlgmr.msra.gmra.mxu0 %v303_v17 }
  0xcc   : > { %v341_v22 = vpop.f32.mrf.mxu0 }
  0xcd   : > { %v342_v23 = vadd.f32 %v575_v20, %v341_v22 }
  0xcf   : > { %v350_v24 = vadd.f32 %v349_v21, %v342_v23 }
  0xd1   : > { %v351_v25 = vmax.f32 %v350_v24, 0.0 }
  0xd3   : > { %352 = vst [vmem:[#allocation2] sm:$0xff] %v351_v25 }
  0xd4   : > { %353 = vst [vmem:[%s896_s29] sm:$0xff] %v351_v25 }
  0xd5   : > { %694 = shalt.err (!%p691_p12)
}
  0xd6   : > { %500 = dma.vmem_to_hbm [thread:$0]  (%p862_p13), %s369_s13, 128, %s371_s15, %s355_s17  }
  0xd7 PF: > { %p522_p0 = scmp.ge.s32.totalorder %s753_s23, 2  ;;  %s382_s16 = sand.u32 1, %s733_s18  }
  0xd8   : > { %s383_s29 = scalar_lea.sflag [#allocation5], %s382_s16 }
  0xd9   : > { %p514_p2 = pnand %p522_p0, %p869_p4 }
  0xdb   : > { %p515_p5 = pneg %p514_p2 }
  0xdd   : > { %728 = dma.done.wait (%p515_p5), %s383_s29, 128  }
  0xde   : > { %730 = vsyncadd (%p515_p5), %s383_s29, 4294967168  ;;  %s22_s23 = sadd.s32 1, %s753_s23   ;;  %s956_s18 = smov %s737_s19 }
  0xdf   : > { %p19_p6 = scmp.ge.s32.totalorder %s22_s23, 8   ;;  %s957_s19 = smov %s741_s20 }
  0xe0   : > { %s958_s20 = smov %s867_s28  ;;  %s959_s21 = smov %s749_s22 }
  0xe1   : > { %s960_s22 = smov %s962_s14  ;;  %21 = sbr.rel (!%p19_p6) target bundleno = 7 (0x7), region = 98 }
  0xe6   :  { %389 = vsyncpa [#allocation4], 1 }
  0xe7   :  { %391 = vsyncpa [#allocation4 + $0x1], 1 }
  0xe8   :  { %392 = vsyncpa [#allocation7], 1 }
  0xe9   :  { %393 = vsyncpa [#allocation5], 1 }
  0xea   :  { %395 = vsyncpa [#allocation5 + $0x1], 1 }

</bundles_post_ra>
